<compile_context>
chip_gen: v7x
topology: tpu7x:2x2x1
jax: 0.10.0
libtpu: 0.0.40
codegen_flags: <defaults>
</compile_context>

<pallas_src>
import functools

import jax
import jax.numpy as jnp
import numpy as np
from jax import lax
from jax.experimental import pallas as pl
from jax.experimental.pallas import tpu as pltpu

_LANE = 128
_SUBLANE = 8
_TN_MAX = 131072      # review target where the scoped limit allows
_MIN_BLOCKS = 8       # keep the grid deep enough for pipelining + 2 TCs (v7x)
_VMEM_BUDGET = 38 << 20


def _round_up(a, b):
    return -(-a // b) * b


def _cdiv(a, b):
    return -(-a // b)


def _focal_loss_kernel(xT_ref, y_ref, o_ref, *, alpha, gamma, int_gamma):
    x = xT_ref[...].astype(jnp.float32)            # (D, TN) logits, classes on sublanes
    y = y_ref[...].astype(jnp.int32)               # (1, TN) labels
    d, tn = x.shape

    # label mask: a single wide compare, reused for both gathers (no one-hot mul)
    row = lax.broadcasted_iota(jnp.int32, (d, tn), 0)
    is_label = row == y                            # (D, TN); y broadcasts (1,TN)->(D,TN)

    m = jnp.max(x, axis=0, keepdims=True)          # (1, TN)
    e = jnp.exp(x - m)                             # (D, TN)
    s = jnp.sum(e, axis=0, keepdims=True)          # (1, TN), >= 1

    # gathered quantities at the label class
    z_y = jnp.sum(jnp.where(is_label, x - m, 0.0), axis=0, keepdims=True)   # x_y - m
    e_y = jnp.sum(jnp.where(is_label, e, 0.0), axis=0, keepdims=True)

    logpt = z_y - jnp.log(s)
    # reuse e for pt instead of a second exp; exact divide keeps <=1e-6 agreement
    # with the torch reference (pl.reciprocal(s, approx=True) is cheaper if ~1e-3
    # relative error on pt is acceptable).
    pt = e_y / s
    one_minus_pt = jnp.maximum(1.0 - pt, 0.0)      # clamp: guards fractional-gamma pow

    if int_gamma is not None:
        # integer power: pure VPU multiplies, no EUP pow
        w = lax.integer_pow(one_minus_pt, int_gamma)
    else:
        w = jnp.power(one_minus_pt, gamma)

    # alpha_t: class 0 gets (1 - alpha), every other class gets alpha
    alpha_t = jnp.where(y == 0, 1.0 - alpha, alpha).astype(jnp.float32)

    o_ref[...] = (-alpha_t) * logpt * w            # (1, TN) lane-dense store


def _pick_sample_tile(n, d, x_itemsize, y_itemsize):
    """Lane-axis (sample) tile + per-lane-column VMEM cost in bytes.

    VMEM accounting uses *padded* block bytes: the x block (d, tn) pads d -> 8
    sublanes, and the y / out (1, tn) blocks each pad 1 -> 8 sublanes; every
    pipeline block is double-buffered.  On top of that we reserve an allowance
    for the large live vector temporaries inside the kernel body (x-m / e plus
    a handful of (1, tn) rows).
    """
    d_pad = _round_up(d, _SUBLANE)
    xcol = d_pad * x_itemsize                      # x block, per lane column
    ycol = _SUBLANE * y_itemsize                   # (1, tn) pads to 8 sublanes
    ocol = _SUBLANE * 4                            # f32 output row
    block_col = 2 * (xcol + ycol + ocol)           # double-buffered pipeline buffers
    live_col = 2 * d_pad * 4 + 10 * 4              # big f32 temps + row temps (crude)
    col_bytes = block_col + live_col

    tn_cap = (_VMEM_BUDGET // col_bytes) // _LANE * _LANE
    tn_cap = max(_LANE, min(_TN_MAX, tn_cap))

    if n < _LANE:
        # tiny problem: one block covering the full (un-padded) lane extent
        return n, col_bytes

    # keep >= _MIN_BLOCKS grid steps for large N (pipelining + v7x 2-TC sharding)
    tn = _round_up(_cdiv(n, _MIN_BLOCKS), _LANE)
    tn = max(_LANE, min(tn, tn_cap))
    return tn, col_bytes


def focal_loss(x, y, *, gamma=2, alpha=0.25, reduction="none", transposed_logits=False):
    """x: [N, D] float logits (or [D, N] with transposed_logits=True), y: [N] ints.

    Matches FocalLoss.forward.  Out-of-range labels yield a finite but
    meaningless loss (x_y treated as 0) instead of torch's gather semantics.
    """
    if transposed_logits:
        d, n = x.shape
        xT = x
    else:
        n, d = x.shape
        # TODO(synk): this [N,D]->[D,N] transpose is the one remaining extra HBM
        # pass; an in-kernel lane de-interleave (roll/MXU) risks becoming
        # XLU/MXU-bound, so producers should emit [D,N] and pass
        # transposed_logits=True to make it free.
        xT = x.T

    if y.dtype not in (np.dtype(np.int32), np.dtype(np.int16), np.dtype(np.int8)):
        y = y.astype(jnp.int32)
    y2 = y.reshape(1, n)                           # free contiguous reshape, no pad

    tn, col_bytes = _pick_sample_tile(n, d, x.dtype.itemsize, y.dtype.itemsize)
    num_blocks = pl.cdiv(n, tn)                    # ragged tail handled by the grid
    vmem_limit = max(tn * col_bytes + (4 << 20), 16 << 20)

    int_gamma = int(gamma) if float(gamma).is_integer() else None

    out = pl.pallas_call(
        functools.partial(
            _focal_loss_kernel,
            alpha=float(alpha),
            gamma=float(gamma),
            int_gamma=int_gamma,
        ),
        out_shape=jax.ShapeDtypeStruct((1, n), jnp.float32),
        grid_spec=pltpu.PrefetchScalarGridSpec(
            num_scalar_prefetch=0,
            grid=(num_blocks,),
            in_specs=[
                pl.BlockSpec((d, tn), lambda i: (0, i)),   # full-D, lane-tiled samples
                pl.BlockSpec((1, tn), lambda i: (0, i)),
            ],
            out_specs=pl.BlockSpec((1, tn), lambda i: (0, i)),
        ),
        compiler_params=pltpu.CompilerParams(
            dimension_semantics=("parallel",),
            vmem_limit_bytes=int(vmem_limit),
        ),
    )(xT, y2)

    per_sample = out[0]                            # == _loss.sum(dim=-1) for [N,1]
    if reduction == "none":
        return per_sample
    return jnp.sum(per_sample)


def _focal_loss_ref(x, y, gamma=2, alpha=0.25):
    logsm = jax.nn.log_softmax(x.astype(jnp.float32), axis=1)
    logpt = jnp.take_along_axis(logsm, y.reshape(-1, 1).astype(jnp.int32), axis=1)
    pt = jnp.exp(logpt)
    alpha_t = jnp.where(y.reshape(-1, 1) == 0, 1.0 - alpha, alpha)
    loss = -alpha_t * logpt * jnp.power(1.0 - pt, gamma)
    return loss.sum(axis=-1)


if __name__ == "__main__":
    key = jax.random.PRNGKey(0)
    kx, ky = jax.random.split(key)

    # Small case matching the module's expected shapes: N samples, D classes.
    N, D = 8, 4
    x = jax.random.normal(kx, (N, D), dtype=jnp.float32)
    y = jax.random.randint(ky, (N,), 0, D, dtype=jnp.int32)

    out = jax.block_until_ready(focal_loss(x, y, gamma=2, alpha=0.25, reduction="none"))
    ref = _focal_loss_ref(x, y)
    assert out.shape == (N,)
    assert np.allclose(np.asarray(out), np.asarray(ref), rtol=1e-4, atol=1e-6)

    # Larger case: multi-block grid + ragged (unpadded) tail block.
    kx2, ky2 = jax.random.split(jax.random.PRNGKey(1))
    N2 = 4097
    x2 = jax.random.normal(kx2, (N2, D), dtype=jnp.float32)
    y2 = jax.random.randint(ky2, (N2,), 0, D, dtype=jnp.int32)
    out2 = jax.block_until_ready(focal_loss(x2, y2, gamma=2, alpha=0.25))
    ref2 = _focal_loss_ref(x2, y2)
    assert out2.shape == (N2,)
    assert np.allclose(np.asarray(out2), np.asarray(ref2), rtol=1e-4, atol=1e-6)

    # 'sum' reduction path.
    tot = jax.block_until_ready(focal_loss(x2, y2, gamma=2, alpha=0.25, reduction="sum"))
    assert np.allclose(float(tot), float(np.sum(np.asarray(ref2))), rtol=1e-4, atol=1e-4)

    print("KERNEL_OK")
</pallas_src>

<mosaic_0001>
module attributes {stable_mosaic.version = 11 : i64} {
  func.func @_focal_loss_kernel(%arg0: i32, %arg1: memref<4x8xf32, #tpu.memory_space<vmem>>, %arg2: memref<1x8xi32, #tpu.memory_space<vmem>>, %arg3: memref<1x8xf32, #tpu.memory_space<vmem>>) attributes {dimension_semantics = [#tpu.dimension_semantics<parallel>], iteration_bounds = array<i64: 1>, scalar_prefetch = 0 : i64, scratch_operands = 0 : i64, tpu.core_type = #tpu.core_type<tc>, window_params = [{transform_indices = @transform_0, window_bounds = array<i64: 4, 8>}, {transform_indices = @transform_1, window_bounds = array<i64: 1, 8>}, {transform_indices = @transform_2, window_bounds = array<i64: 1, 8>}]} {
    %c0 = arith.constant 0 : index
    %c0_0 = arith.constant 0 : index
    %0 = vector.load %arg1[%c0, %c0_0] : memref<4x8xf32, #tpu.memory_space<vmem>>, vector<4x8xf32>
    %c0_1 = arith.constant 0 : index
    %c0_2 = arith.constant 0 : index
    %1 = vector.load %arg2[%c0_1, %c0_2] : memref<1x8xi32, #tpu.memory_space<vmem>>, vector<1x8xi32>
    %2 = tpu.iota {dimensions = array<i32: 0>} : vector<4x8xi32>
    %3 = vector.broadcast %1 : vector<1x8xi32> to vector<4x8xi32>
    %4 = arith.cmpi eq, %2, %3 : vector<4x8xi32>
    %cst = arith.constant dense<0xFF800000> : vector<8xf32>
    %5 = vector.multi_reduction <maximumf>, %0, %cst [0] : vector<4x8xf32> to vector<8xf32>
    %6 = vector.shape_cast %5 : vector<8xf32> to vector<1x8xf32>
    %7 = vector.broadcast %6 : vector<1x8xf32> to vector<4x8xf32>
    %8 = arith.subf %0, %7 : vector<4x8xf32>
    %9 = math.exp %8 : vector<4x8xf32>
    %cst_3 = arith.constant dense<0.000000e+00> : vector<8xf32>
    %10 = vector.multi_reduction <add>, %9, %cst_3 [0] : vector<4x8xf32> to vector<8xf32>
    %11 = vector.shape_cast %10 : vector<8xf32> to vector<1x8xf32>
    %12 = vector.broadcast %6 : vector<1x8xf32> to vector<4x8xf32>
    %13 = arith.subf %0, %12 : vector<4x8xf32>
    %cst_4 = arith.constant 0.000000e+00 : f32
    %14 = vector.broadcast %cst_4 : f32 to vector<4x8xf32>
    %15 = arith.select %4, %13, %14 : vector<4x8xi1>, vector<4x8xf32>
    %cst_5 = arith.constant dense<0.000000e+00> : vector<8xf32>
    %16 = vector.multi_reduction <add>, %15, %cst_5 [0] : vector<4x8xf32> to vector<8xf32>
    %17 = vector.shape_cast %16 : vector<8xf32> to vector<1x8xf32>
    %cst_6 = arith.constant 0.000000e+00 : f32
    %18 = vector.broadcast %cst_6 : f32 to vector<4x8xf32>
    %19 = arith.select %4, %9, %18 : vector<4x8xi1>, vector<4x8xf32>
    %cst_7 = arith.constant dense<0.000000e+00> : vector<8xf32>
    %20 = vector.multi_reduction <add>, %19, %cst_7 [0] : vector<4x8xf32> to vector<8xf32>
    %21 = vector.shape_cast %20 : vector<8xf32> to vector<1x8xf32>
    %22 = math.log %11 : vector<1x8xf32>
    %23 = arith.subf %17, %22 : vector<1x8xf32>
    %24 = arith.divf %21, %11 : vector<1x8xf32>
    %cst_8 = arith.constant 1.000000e+00 : f32
    %25 = vector.broadcast %cst_8 : f32 to vector<1x8xf32>
    %26 = arith.subf %25, %24 : vector<1x8xf32>
    %cst_9 = arith.constant 0.000000e+00 : f32
    %27 = vector.broadcast %cst_9 : f32 to vector<1x8xf32>
    %28 = arith.maximumf %26, %27 : vector<1x8xf32>
    %29 = arith.mulf %28, %28 : vector<1x8xf32>
    %c0_i32 = arith.constant 0 : i32
    %30 = vector.broadcast %c0_i32 : i32 to vector<1x8xi32>
    %31 = arith.cmpi eq, %1, %30 : vector<1x8xi32>
    %cst_10 = arith.constant 7.500000e-01 : f32
    %cst_11 = arith.constant 2.500000e-01 : f32
    %32 = vector.broadcast %cst_10 : f32 to vector<1x8xf32>
    %33 = vector.broadcast %cst_11 : f32 to vector<1x8xf32>
    %34 = arith.select %31, %32, %33 : vector<1x8xi1>, vector<1x8xf32>
    %cst_12 = arith.constant 0.000000e+00 : f32
    %35 = vector.broadcast %cst_12 : f32 to vector<1x8xf32>
    %36 = arith.subf %35, %34 : vector<1x8xf32>
    %37 = arith.mulf %36, %23 : vector<1x8xf32>
    %38 = arith.mulf %37, %29 : vector<1x8xf32>
    %c0_13 = arith.constant 0 : index
    %c0_14 = arith.constant 0 : index
    %39 = vector.load %arg3[%c0_13, %c0_14] : memref<1x8xf32, #tpu.memory_space<vmem>>, vector<1x8xf32>
    tpu.vector_store %arg3[%c0_13, %c0_14], %38 {strides = array<i32>} : memref<1x8xf32, #tpu.memory_space<vmem>>, vector<1x8xf32>,
    return
  }
  func.func @transform_0(%arg0: i32) -> (i32, i32) {
    %c0_i32 = arith.constant 0 : i32
    %c0_i32_0 = arith.constant 0 : i32
    return %c0_i32, %arg0 : i32, i32
  }
  func.func @transform_1(%arg0: i32) -> (i32, i32) {
    %c0_i32 = arith.constant 0 : i32
    %c0_i32_0 = arith.constant 0 : i32
    return %c0_i32, %arg0 : i32, i32
  }
  func.func @transform_2(%arg0: i32) -> (i32, i32) {
    %c0_i32 = arith.constant 0 : i32
    %c0_i32_0 = arith.constant 0 : i32
    return %c0_i32, %arg0 : i32, i32
  }
}

</mosaic_0001>

<bundles_post_ra>
// kernel: tpu_custom_call.1
= control target key start
LH: loop header
LB: loop body
LE: loop exit
PB: predicated region body
PF: predicated region fallthrough
CT: control target
= control target key end

     0   :  { %7 = vsyncpa [#allocation3], 0  ;;  %s203_s0 = inlined_call_operand.hbm [shape: f32[4,8], index: 0, kind: input, shape index: {}]   ;;  %s204_s1 = inlined_call_operand.vmem [shape: s32[1,8], index: 1, kind: input, shape index: {}]   ;;  %s205_s2 = inlined_call_operand.hbm [shape: f32[1,8], index: 2, kind: output, shape index: {}]  }
   0x1   :  { %8 = vsyncpa [#allocation4], 0  ;;  %s154_s9 = smov [#allocation2]   ;;  %s106_s13 = scalar_lea.hbm %s203_s0, 64 }
   0x2   :  { %s15_s10 = sshll.u32 %s154_s9, 4  ;;  %p107_p0 = scmp.ne.s32.totalorder %s203_s0, %s106_s13  ;;  %s16_s10 = int_to_ptr.vmem [resolvable:$true] %s15_s10 }
   0x3   :  { %p110_p1 = scmp.lt.u32.totalorder %s106_s13, %s203_s0 }
   0x5   :  { %p112_p2 = pnand %p110_p1, %p107_p0 }
   0x7   :  { %115 = shalt.err (!%p112_p2)
}
   0x8   :  { %s116_s18 = scalar_lea.vmem %s16_s10, 64  ;;  %p121_p4 = scmp.lt.s32.totalorder %s16_s10, %s16_s10 }
   0x9   :  { %p117_p3 = scmp.ne.s32.totalorder %s16_s10, %s116_s18  ;;  %p122_p5 = scmp.lt.s32.totalorder %s116_s18, %s116_s18 }
   0xb   :  { %p123_p6 = por %p122_p5, %p121_p4 }
   0xd   :  { %p124_p7 = pnand %p123_p6, %p117_p3 }
   0xf   :  { %127 = shalt.err (!%p124_p7)
}
  0x10   :  { %18 = dma.hbm_to_vmem [thread:$0]  %s203_s0, 64, %s16_s10, [#allocation3]  }
  0x11   :  { %150 = dma.done.wait [#allocation3], 64  }
  0x12   :  { %151 = vsyncadd [#allocation3], 4294967232  ;;  %vm33_vm0 = vcmask 60416   ;;  %v24_v0 = vld [vmem:[#allocation2] sm:$0xf]  ;;  %v26_v5 = vlaneseq  ;;  %v155_v39 = vmov 0.25  }
  0x13   :  { %v34_v1 = vsel %vm33_vm0, %v24_v0, -inf  ;;  %v25_v13 = vld [vmem:[%s204_s1] sm:$0x1]  ;;  %s156_s0 = smov [#allocation5]   ;;  %vm80_vm3 = vcmask 57344  }
  0x14   :  { %v35_v2 = vrot.slane %v34_v1, 4  ;;  %v27_v8 = vshrl.u32 %v26_v5, 7  ;;  %vm75_vm2 = vcmp.eq.s32.totalorder %v25_v13, 0  ;;  %s88_s1 = sshll.u32 %s156_s0, 4  ;;  %s89_s1 = int_to_ptr.vmem [resolvable:$true] %s88_s1 }
  0x15   :  { %v76_v40 = vsel %vm75_vm2, 0.75, %v155_v39  ;;  %s128_s23 = scalar_lea.vmem %s89_s1, 16  ;;  %s132_s24 = scalar_lea.vmem %s89_s1, 32 }
  0x16   :  { %v36_v3 = vmax.f32 %v34_v1, %v35_v2  ;;  %v30_v11 = vsub.s32 0, %v27_v8  ;;  %v77_v45 = vsub.f32 0.0, %v76_v40  ;;  %p129_p8 = scmp.ne.s32.totalorder %s89_s1, %s128_s23  ;;  %p133_p9 = scmp.lt.s32.totalorder %s89_s1, %s89_s1 }
  0x17   :  { %p134_p10 = scmp.lt.s32.totalorder %s132_s24, %s128_s23 }
  0x18   :  { %v37_v4 = vrot.slane %v36_v3, 2  ;;  %v31_v14 = vrot.slane %v25_v13, %v30_v11 }
  0x19   :  { %p135_p11 = por %p134_p10, %p133_p9 }
  0x1a   :  { %v38_v6 = vmax.f32 %v36_v3, %v37_v4  ;;  %vm32_vm1 = vcmp.eq.s32.totalorder %v27_v8, %v31_v14 }
  0x1b   :  { %p136_p12 = pnand %p135_p11, %p129_p8 }
  0x1c   :  { %v39_v7 = vrot.slane %v38_v6, 1 }
  0x1e   :  { %v40_v9 = vmax.f32 %v38_v6, %v39_v7 }
  0x20   :  { %v41_v10 = vsub.f32 %v24_v0, %v40_v9 }
  0x22   :  { %v42_v12 = vmul.f32 1.442695, %v41_v10  ;;  %v51_v15 = vsel %vm32_vm1, %v41_v10, 0.0 }
  0x23   :  { %v52_v17 = vsel %vm33_vm0, %v51_v15, 0.0 }
  0x24   :  { %100 = vpow2.f32 %v42_v12  ;;  %v53_v22 = vrot.slane %v52_v17, 4 }
  0x26   :  { %v54_v27 = vadd.f32 %v53_v22, %v52_v17 }
  0x28   :  { %v55_v31 = vrot.slane %v54_v27, 2 }
  0x2a   :  { %v56_v34 = vadd.f32 %v55_v31, %v54_v27 }
  0x2c   :  { %v57_v36 = vrot.slane %v56_v34, 1 }
  0x2e   :  { %v101_v16 = vpop.eup %100  ;;  %v58_v38 = vadd.f32 %v57_v36, %v56_v34 }
  0x2f   :  { %v44_v18 = vsel %vm33_vm0, %v101_v16, 0.0  ;;  %v59_v19 = vsel %vm32_vm1, %v101_v16, 0.0 }
  0x30   :  { %v45_v20 = vrot.slane %v44_v18, 4  ;;  %v60_v21 = vsel %vm33_vm0, %v59_v19, 0.0 }
  0x31   :  { %v61_v23 = vrot.slane %v60_v21, 4 }
  0x32   :  { %v46_v24 = vadd.f32 %v45_v20, %v44_v18 }
  0x33   :  { %v62_v26 = vadd.f32 %v61_v23, %v60_v21 }
  0x34   :  { %v47_v25 = vrot.slane %v46_v24, 2 }
  0x35   :  { %v63_v30 = vrot.slane %v62_v26, 2 }
  0x36   :  { %v48_v28 = vadd.f32 %v47_v25, %v46_v24 }
  0x37   :  { %v64_v33 = vadd.f32 %v63_v30, %v62_v26 }
  0x38   :  { %v49_v29 = vrot.slane %v48_v28, 1 }
  0x39   :  { %v65_v35 = vrot.slane %v64_v33, 1 }
  0x3a   :  { %v50_v32 = vadd.f32 %v49_v29, %v48_v28 }
  0x3b   :  { %v66_v37 = vadd.f32 %v65_v35, %v64_v33 }
  0x3c   :  { %102 = vlog2.f32 %v50_v32 }
  0x3d   :  { %104 = vrcp.f32 %v50_v32 }
  0x46   :  { %v103_v41 = vpop.eup %102 }
  0x47   :  { %v105_v42 = vpop.eup %104  ;;  %v68_v43 = vmul.f32 0.6931472, %v103_v41 }
  0x48   :  { %v71_v44 = vmul.f32 %v105_v42, %v66_v37 }
  0x49   :  { %v69_v46 = vsub.f32 %v58_v38, %v68_v43 }
  0x4a   :  { %v72_v47 = vsub.f32 1.0, %v71_v44 }
  0x4b   :  { %v78_v49 = vmul.f32 %v77_v45, %v69_v46 }
  0x4c   :  { %v73_v48 = vmax.f32 %v72_v47, 0.0 }
  0x4e   :  { %v74_v50 = vmul.f32 %v73_v48, %v73_v48 }
  0x50   :  { %v79_v51 = vmul.f32 %v78_v49, %v74_v50 }
  0x52   :  { %81 = vst.msk [vmem:[#allocation5] sm:$0x1] %vm80_vm3, %v79_v51 }
  0x53   :  { %139 = shalt.err (!%p136_p12)
}
  0x54   :  { %s140_s27 = scalar_lea.hbm %s205_s2, 16 }
  0x55   :  { %p141_p13 = scmp.ne.s32.totalorder %s205_s2, %s140_s27  ;;  %p144_p0 = scmp.lt.u32.totalorder %s140_s27, %s205_s2 }
  0x57   :  { %p146_p1 = pnand %p144_p0, %p141_p13 }
  0x59   :  { %149 = shalt.err (!%p146_p1)
}
  0x5a   :  { %91 = dma.vmem_to_hbm [thread:$0]  %s89_s1, 16, %s205_s2, [#allocation4]  }
  0x5b   :  { %152 = dma.done.wait [#allocation4], 16  }
  0x5c   :  { %153 = vsyncadd [#allocation4], 4294967280 }
  0x5d   :  { %95 = vsyncpa [#allocation3], 1 }
  0x5e   :  { %96 = vsyncpa [#allocation4], 1 }

</bundles_post_ra>
